<compile_context>
chip_gen: v7x
topology: tpu7x:2x2x1
jax: 0.10.0
libtpu: 0.0.40
codegen_flags: <defaults>
</compile_context>

<pallas_src>
import functools

import jax
import jax.numpy as jnp
from jax import lax
from jax.experimental import pallas as pl
from jax.experimental.pallas import tpu as pltpu


def _lstm_fc_kernel(x_ref, wih_ref, whh_ref, b_ref, wfc_ref, bfc_ref, out_ref):
    """Whole forward pass in one VMEM-resident kernel.

    x_ref   : (T, B, D)     float32  (time-major)
    wih_ref : (D, 4*Hp)     f32/bf16 (lane-padded W_ih^T, gate blocks at k*Hp)
    whh_ref : (Hp, 4*Hp)    f32/bf16 (lane-padded W_hh^T)
    b_ref   : (1, 4*Hp)     float32  (b_ih + b_hh, lane-padded)
    wfc_ref : (Hp, O)       f32/bf16 (W_fc^T, zero rows for padded hidden lanes)
    bfc_ref : (1, O)        float32
    out_ref : (B, O)        float32
    """
    T, B, D = x_ref.shape
    Hp = whh_ref.shape[0]           # lane-padded hidden width (multiple of 128)
    wdt = wih_ref.dtype             # compute/weight dtype (f32 or bf16)
    bias = b_ref[...]               # (1, 4*Hp) f32, broadcast over batch

    def gate_update(gates, c):
        # Hp is a multiple of 128 -> every slice below is lane-aligned (no XLU shuffles).
        i_g = jax.nn.sigmoid(gates[:, 0 * Hp:1 * Hp])
        f_g = jax.nn.sigmoid(gates[:, 1 * Hp:2 * Hp])
        g_g = jnp.tanh(gates[:, 2 * Hp:3 * Hp])
        o_g = jax.nn.sigmoid(gates[:, 3 * Hp:4 * Hp])
        c_new = f_g * c + i_g * g_g
        h_new = o_g * jnp.tanh(c_new)
        return h_new, c_new

    # ---- t = 0: h0 == 0, so the (B,Hp)x(Hp,4Hp) recurrent matmul is a guaranteed no-op.
    g0 = jnp.dot(x_ref[0].astype(wdt), wih_ref[...],
                 preferred_element_type=jnp.float32) + bias
    h, c = gate_update(g0, jnp.zeros((B, Hp), jnp.float32))

    # ---- remaining steps. T is static: unroll short sequences (the module uses T == 1,
    # so this section disappears entirely); fall back to fori_loop for long sequences.
    def one_step(x_t, h, c):
        g = (jnp.dot(x_t.astype(wdt), wih_ref[...], preferred_element_type=jnp.float32)
             + jnp.dot(h.astype(wdt), whh_ref[...], preferred_element_type=jnp.float32)
             + bias)
        return gate_update(g, c)

    if 1 < T <= 8:
        for t in range(1, T):
            h, c = one_step(x_ref[t], h, c)
    elif T > 8:
        def body(t, carry):
            h, c = carry
            return one_step(x_ref[t], h, c)
        h, c = lax.fori_loop(1, T, body, (h, c))

    # ---- hn = relu(h_n.view(-1, H)); out = fc(hn).  Padded lanes of h are 0 -> relu 0 ->
    # multiplied by zero rows of wfc -> no contribution.
    hn = jnp.maximum(h, 0.0)
    out = jnp.dot(hn.astype(wdt), wfc_ref[...],
                  preferred_element_type=jnp.float32) + bfc_ref[...]
    out_ref[...] = out.astype(out_ref.dtype)


def prepare_params(w_ih, w_hh, b_ih, b_hh, w_fc, b_fc, compute_dtype=jnp.float32):
    """One-time weight repack (call at parameter-load time and cache the result).

    - transposes weights to (in, out) layout for the kernel's dots,
    - pads each of the 4 gate blocks to Hp = round_up(H, 128) lanes so in-kernel gate
      slices are lane-aligned,
    - pre-sums b_ih + b_hh,
    - optionally casts weights to bf16 (biases stay f32; dots accumulate in f32).
    """
    H4, D = w_ih.shape
    H = H4 // 4
    O = w_fc.shape[0]
    Hp = ((H + 127) // 128) * 128

    wih_t = jnp.zeros((D, 4 * Hp), jnp.float32)
    whh_t = jnp.zeros((Hp, 4 * Hp), jnp.float32)
    b_sum = jnp.zeros((1, 4 * Hp), jnp.float32)
    for g in range(4):  # PyTorch gate order: i, f, g, o
        wih_t = wih_t.at[:, g * Hp:g * Hp + H].set(w_ih[g * H:(g + 1) * H, :].T)
        whh_t = whh_t.at[:H, g * Hp:g * Hp + H].set(w_hh[g * H:(g + 1) * H, :].T)
        b_sum = b_sum.at[:, g * Hp:g * Hp + H].set(
            (b_ih[g * H:(g + 1) * H] + b_hh[g * H:(g + 1) * H])[None, :])
    wfc_t = jnp.zeros((Hp, O), jnp.float32).at[:H, :].set(w_fc.T)
    bfc_2d = b_fc.reshape(1, O).astype(jnp.float32)

    return (wih_t.astype(compute_dtype), whh_t.astype(compute_dtype), b_sum,
            wfc_t.astype(compute_dtype), bfc_2d)


@jax.jit
def custom_lstm_forward(x_btd, wih_t, whh_t, b_sum, wfc_t, bfc_2d):
    """x_btd: (B, T, D) float32 (batch_first, like the PyTorch module).

    Weights must come from prepare_params (already transposed / padded / cast),
    so the only per-call work besides the kernel is the trivial x layout change.
    """
    B, T, D = x_btd.shape
    O = wfc_t.shape[1]
    x_tbd = jnp.transpose(x_btd, (1, 0, 2)).astype(jnp.float32)  # (T, B, D); free for T == 1

    vmem = pl.BlockSpec(memory_space=pltpu.MemorySpace.VMEM)
    return pl.pallas_call(
        _lstm_fc_kernel,
        out_shape=jax.ShapeDtypeStruct((B, O), jnp.float32),
        in_specs=[vmem] * 6,
        out_specs=vmem,
    )(x_tbd, wih_t, whh_t, b_sum, wfc_t, bfc_2d)


def _reference_forward(x_btd, w_ih, w_hh, b_ih, b_hh, w_fc, b_fc):
    """Pure-JAX f32 reference mirroring the PyTorch module."""
    B, T, D = x_btd.shape
    H = w_hh.shape[1]
    h = jnp.zeros((B, H), jnp.float32)
    c = jnp.zeros((B, H), jnp.float32)
    for t in range(T):
        x_t = x_btd[:, t, :]
        gates = x_t @ w_ih.T + b_ih + h @ w_hh.T + b_hh
        i_g = jax.nn.sigmoid(gates[:, 0 * H:1 * H])
        f_g = jax.nn.sigmoid(gates[:, 1 * H:2 * H])
        g_g = jnp.tanh(gates[:, 2 * H:3 * H])
        o_g = jax.nn.sigmoid(gates[:, 3 * H:4 * H])
        c = f_g * c + i_g * g_g
        h = o_g * jnp.tanh(c)
    hn = jnp.maximum(h, 0.0)
    return hn @ w_fc.T + b_fc.reshape(1, -1)


if __name__ == "__main__":
    # Shapes consistent with the module: x reshaped to (B, 1, input_size); hidden_size = 130
    # (from the spec); single LSTM layer; fc to output_size = 1.
    batch = 2
    seq = 1
    input_size = 16
    hidden_size = 130
    output_size = 1

    key = jax.random.PRNGKey(0)
    k = jax.random.split(key, 8)
    bound = 1.0 / jnp.sqrt(hidden_size)

    x = jax.random.normal(k[0], (batch, seq, input_size), dtype=jnp.float32)
    w_ih = jax.random.uniform(k[1], (4 * hidden_size, input_size), minval=-bound, maxval=bound)
    w_hh = jax.random.uniform(k[2], (4 * hidden_size, hidden_size), minval=-bound, maxval=bound)
    b_ih = jax.random.uniform(k[3], (4 * hidden_size,), minval=-bound, maxval=bound)
    b_hh = jax.random.uniform(k[4], (4 * hidden_size,), minval=-bound, maxval=bound)
    w_fc = jax.random.uniform(k[5], (output_size, hidden_size), minval=-bound, maxval=bound)
    b_fc = jax.random.uniform(k[6], (output_size,), minval=-bound, maxval=bound)

    ref = _reference_forward(x, w_ih, w_hh, b_ih, b_hh, w_fc, b_fc)

    # --- f32 weights: exact-semantics path, strict tolerance.
    params_f32 = prepare_params(w_ih, w_hh, b_ih, b_hh, w_fc, b_fc, compute_dtype=jnp.float32)
    out = jax.block_until_ready(custom_lstm_forward(x, *params_f32))
    assert out.shape == (batch, output_size), out.shape
    assert jnp.allclose(out, ref, atol=1e-5, rtol=1e-5), (out, ref)

    # --- bf16 weights: halves weight DMA/VMEM bytes; f32 accumulation -> loose tolerance.
    params_bf16 = prepare_params(w_ih, w_hh, b_ih, b_hh, w_fc, b_fc, compute_dtype=jnp.bfloat16)
    out_bf16 = jax.block_until_ready(custom_lstm_forward(x, *params_bf16))
    assert out_bf16.shape == (batch, output_size), out_bf16.shape
    assert jnp.allclose(out_bf16, ref, atol=5e-2, rtol=5e-2), (out_bf16, ref)

    print("KERNEL_OK")
</pallas_src>

<mosaic_0001>
module attributes {stable_mosaic.version = 11 : i64} {
  func.func @_lstm_fc_kernel(%arg0: memref<1x2x16xf32, #tpu.memory_space<vmem>>, %arg1: memref<16x1024xf32, #tpu.memory_space<vmem>>, %arg2: memref<256x1024xf32, #tpu.memory_space<vmem>>, %arg3: memref<1x1024xf32, #tpu.memory_space<vmem>>, %arg4: memref<256x1xf32, #tpu.memory_space<vmem>>, %arg5: memref<1x1xf32, #tpu.memory_space<vmem>>, %arg6: memref<2x1xf32, #tpu.memory_space<vmem>>) attributes {dimension_semantics = [], scalar_prefetch = 0 : i64, scratch_operands = 0 : i64, tpu.core_type = #tpu.core_type<tc>} {
    %c0 = arith.constant 0 : index
    %c0_0 = arith.constant 0 : index
    %0 = vector.load %arg3[%c0, %c0_0] : memref<1x1024xf32, #tpu.memory_space<vmem>>, vector<1x1024xf32>
    %c0_1 = arith.constant 0 : index
    %c0_2 = arith.constant 0 : index
    %c0_3 = arith.constant 0 : index
    %1 = vector.load %arg0[%c0_1, %c0_2, %c0_3] : memref<1x2x16xf32, #tpu.memory_space<vmem>>, vector<1x2x16xf32>
    %2 = vector.shape_cast %1 : vector<1x2x16xf32> to vector<2x16xf32>
    %c0_4 = arith.constant 0 : index
    %c0_5 = arith.constant 0 : index
    %3 = vector.load %arg1[%c0_4, %c0_5] : memref<16x1024xf32, #tpu.memory_space<vmem>>, vector<16x1024xf32>
    %cst = arith.constant dense<0.000000e+00> : vector<2x1024xf32>
    %4 = tpu.matmul %2, %3, %cst {dimension_numbers = #tpu.dot_dimension_numbers<[1], [0], [0], [1], [0, 0, 1, 1], [], []>} : vector<2x16xf32>, vector<16x1024xf32>, vector<2x1024xf32> -> vector<2x1024xf32>
    %5 = vector.broadcast %0 : vector<1x1024xf32> to vector<2x1024xf32>
    %6 = arith.addf %4, %5 : vector<2x1024xf32>
    %cst_6 = arith.constant 0.000000e+00 : f32
    %7 = vector.broadcast %cst_6 : f32 to vector<2x256xf32>
    %8 = vector.extract_strided_slice %6 {offsets = [0, 0], sizes = [2, 256], strides = [1, 1]} : vector<2x1024xf32> to vector<2x256xf32>
    %9 = arith.negf %8 : vector<2x256xf32>
    %10 = math.exp %9 : vector<2x256xf32>
    %cst_7 = arith.constant 1.000000e+00 : f32
    %11 = vector.broadcast %cst_7 : f32 to vector<2x256xf32>
    %12 = arith.addf %11, %10 : vector<2x256xf32>
    %13 = arith.divf %11, %12 : vector<2x256xf32>
    %14 = vector.extract_strided_slice %6 {offsets = [0, 256], sizes = [2, 256], strides = [1, 1]} : vector<2x1024xf32> to vector<2x256xf32>
    %15 = arith.negf %14 : vector<2x256xf32>
    %16 = math.exp %15 : vector<2x256xf32>
    %cst_8 = arith.constant 1.000000e+00 : f32
    %17 = vector.broadcast %cst_8 : f32 to vector<2x256xf32>
    %18 = arith.addf %17, %16 : vector<2x256xf32>
    %19 = arith.divf %17, %18 : vector<2x256xf32>
    %20 = vector.extract_strided_slice %6 {offsets = [0, 512], sizes = [2, 256], strides = [1, 1]} : vector<2x1024xf32> to vector<2x256xf32>
    %21 = math.tanh %20 : vector<2x256xf32>
    %22 = vector.extract_strided_slice %6 {offsets = [0, 768], sizes = [2, 256], strides = [1, 1]} : vector<2x1024xf32> to vector<2x256xf32>
    %23 = arith.negf %22 : vector<2x256xf32>
    %24 = math.exp %23 : vector<2x256xf32>
    %cst_9 = arith.constant 1.000000e+00 : f32
    %25 = vector.broadcast %cst_9 : f32 to vector<2x256xf32>
    %26 = arith.addf %25, %24 : vector<2x256xf32>
    %27 = arith.divf %25, %26 : vector<2x256xf32>
    %28 = arith.mulf %19, %7 : vector<2x256xf32>
    %29 = arith.mulf %13, %21 : vector<2x256xf32>
    %30 = arith.addf %28, %29 : vector<2x256xf32>
    %31 = math.tanh %30 : vector<2x256xf32>
    %32 = arith.mulf %27, %31 : vector<2x256xf32>
    %cst_10 = arith.constant 0.000000e+00 : f32
    %33 = vector.broadcast %cst_10 : f32 to vector<2x256xf32>
    %34 = arith.maximumf %32, %33 : vector<2x256xf32>
    %c0_11 = arith.constant 0 : index
    %c0_12 = arith.constant 0 : index
    %35 = vector.load %arg4[%c0_11, %c0_12] : memref<256x1xf32, #tpu.memory_space<vmem>>, vector<256x1xf32>
    %cst_13 = arith.constant dense<0.000000e+00> : vector<2x1xf32>
    %36 = tpu.matmul %34, %35, %cst_13 {dimension_numbers = #tpu.dot_dimension_numbers<[1], [0], [0], [1], [0, 0, 1, 1], [], []>} : vector<2x256xf32>, vector<256x1xf32>, vector<2x1xf32> -> vector<2x1xf32>
    %c0_14 = arith.constant 0 : index
    %c0_15 = arith.constant 0 : index
    %37 = vector.load %arg5[%c0_14, %c0_15] : memref<1x1xf32, #tpu.memory_space<vmem>>, vector<1x1xf32>
    %38 = vector.broadcast %37 : vector<1x1xf32> to vector<2x1xf32>
    %39 = arith.addf %36, %38 : vector<2x1xf32>
    %c0_16 = arith.constant 0 : index
    %c0_17 = arith.constant 0 : index
    %40 = vector.load %arg6[%c0_16, %c0_17] : memref<2x1xf32, #tpu.memory_space<vmem>>, vector<2x1xf32>
    tpu.vector_store %arg6[%c0_16, %c0_17], %39 {strides = array<i32>} : memref<2x1xf32, #tpu.memory_space<vmem>>, vector<2x1xf32>,
    return
  }
}

</mosaic_0001>

<bundles_post_ra>
// kernel: custom_lstm_forward.1
= control target key start
LH: loop header
LB: loop body
LE: loop exit
PB: predicated region body
PF: predicated region fallthrough
CT: control target
= control target key end

     0   :  { %s917_s0 = inlined_call_operand.vmem [shape: f32[1,2,16], index: 0, kind: input, shape index: {}]   ;;  %s918_s1 = inlined_call_operand.vmem [shape: f32[16,1024], index: 1, kind: input, shape index: {}]   ;;  %s919_s2 = inlined_call_operand.hbm [shape: f32[256,1024], index: 2, kind: input, shape index: {}]   ;;  %s920_s3 = inlined_call_operand.vmem [shape: f32[1,1024], index: 3, kind: input, shape index: {}]   ;;  %s921_s4 = inlined_call_operand.vmem [shape: f32[256,1], index: 4, kind: input, shape index: {}]   ;;  %s922_s5 = inlined_call_operand.<no memory space> [shape: f32[1,1], index: 5, kind: input, shape index: {}]   ;;  %s923_s6 = inlined_call_operand.vmem [shape: f32[2,1], index: 6, kind: output, shape index: {}]  }
   0x1   :  { %v11_v0 = vstv %s922_s5 }
   0x2   :  { %12 = vst [vmem:[#allocation2] sm:$0x1] %v11_v0 }
   0x3   :  { %13 = vsyncpa [#allocation4], 0  ;;  %s706_s23 = smov [#allocation3]   ;;  %s682_s27 = scalar_lea.hbm %s919_s2, 32768 }
   0x4   :  { %s23_s24 = sshll.u32 %s706_s23, 4  ;;  %p683_p0 = scmp.ne.s32.totalorder %s919_s2, %s682_s27  ;;  %s24_s24 = int_to_ptr.vmem [resolvable:$true] %s23_s24 }
   0x5   :  { %p686_p1 = scmp.lt.u32.totalorder %s682_s27, %s919_s2 }
   0x7   :  { %p688_p2 = pnand %p686_p1, %p683_p0 }
   0x9   :  { %691 = shalt.err (!%p688_p2)
}
   0xa   :  { %s692_s5 = scalar_lea.vmem %s24_s24, 32768  ;;  %p697_p4 = scmp.lt.s32.totalorder %s24_s24, %s24_s24 }
   0xb   :  { %p693_p3 = scmp.ne.s32.totalorder %s24_s24, %s692_s5  ;;  %p698_p5 = scmp.lt.s32.totalorder %s692_s5, %s692_s5 }
   0xd   :  { %p699_p6 = por %p698_p5, %p697_p4 }
   0xf   :  { %p700_p7 = pnand %p699_p6, %p693_p3 }
  0x11   :  { %703 = shalt.err (!%p700_p7)
}
  0x12   :  { %s707_s8 = smov 1024   ;;  %s708_s9 = smov 64  }
  0x13   :  { %29 = dma.hbm_to_vmem [thread:$0]  %s919_s2, 32768, %s24_s24, [#allocation4], %s707_s8, %s707_s8, %s708_s9  }
  0x14   :  { %704 = dma.done.wait [#allocation4], 32768  }
  0x15   :  { %705 = vsyncadd [#allocation4], 4294934528  ;;  %v709_v1 = vmov 0.0   ;;  %v42_v2 = vld [vmem:[%s918_s1 + $0x8] sm:$0xff]  ;;  %v41_v4 = vld [vmem:[%s918_s1] sm:$0xff]  ;;  %vm98_vm0 = vcmask 130048  }
  0x16   :  { %166 = vmatprep.mubr.f32.mxu1 %v709_v1  ;;  %v50_v3 = vld [vmem:[%s918_s1 + $0x48] sm:$0xff]  ;;  %v49_v6 = vld [vmem:[%s918_s1 + $0x40] sm:$0xff]  ;;  %v44_v7 = vld [vmem:[%s918_s1 + $0x18] sm:$0xff]  ;;  %vm545_vm1 = vcmask 1024  }
  0x17   :  { %v598_v5 = vpack.c.bf16 %v50_v3, %v42_v2  ;;  %v600_v8 = vpack.c.bf16 %v49_v6, %v41_v4  ;;  %v52_v9 = vld [vmem:[%s918_s1 + $0x58] sm:$0xff]  ;;  %v43_v10 = vld [vmem:[%s918_s1 + $0x10] sm:$0xff]  ;;  %v46_v13 = vld [vmem:[%s918_s1 + $0x28] sm:$0xff] }
  0x18   :  { %v51_v11 = vld [vmem:[%s918_s1 + $0x50] sm:$0xff]  ;;  %v602_v12 = vpack.c.bf16 %v52_v9, %v44_v7  ;;  %v54_v14 = vld [vmem:[%s918_s1 + $0x68] sm:$0xff]  ;;  %v40_v15 = vld [vmem:[%s917_s0] sm:$0x3] }
  0x19   :  { %599 = vmatprep.subr.bf16.mxu1 %v598_v5  ;;  %v604_v16 = vpack.c.bf16 %v51_v11, %v43_v10  ;;  %v606_v17 = vpack.c.bf16 %v54_v14, %v46_v13  ;;  %v45_v18 = vld [vmem:[%s918_s1 + $0x20] sm:$0xff]  ;;  %v48_v20 = vld [vmem:[%s918_s1 + $0x38] sm:$0xff]  ;;  %v47_v24 = vld [vmem:[%s918_s1 + $0x30] sm:$0xff]  ;;  %v58_v11 = vlaneseq }
  0x1a   :  { %601 = vmatpush1.bf16.msra.mxu1 %v600_v8  ;;  %v53_v19 = vld [vmem:[%s918_s1 + $0x60] sm:$0xff]  ;;  %v56_v21 = vld [vmem:[%s918_s1 + $0x78] sm:$0xff]  ;;  %v55_v25 = vld [vmem:[%s918_s1 + $0x70] sm:$0xff] }
  0x1b   :  { %603 = vmatprep.subr.bf16.mxu1 %v602_v12  ;;  %v608_v22 = vpack.c.bf16 %v53_v19, %v45_v18  ;;  %v610_v23 = vpack.c.bf16 %v56_v21, %v48_v20  ;;  %v612_v26 = vpack.c.bf16 %v55_v25, %v47_v24  ;;  %v452_v27 = vld [vmem:[%s921_s4 + $0x80] sm:$0xff]  ;;  %v453_v28 = vld [vmem:[%s921_s4 + $0x88] sm:$0xff]  ;;  %v454_v33 = vld [vmem:[%s921_s4 + $0x90] sm:$0xff]  ;;  %v59_v12 = vshrl.u32 %v58_v11, 7 }
  0x1c   :  { %v614_v29 = vpack.c.bf16 %v453_v28, %v452_v27  ;;  %v436_v30 = vld [vmem:[%s921_s4] sm:$0xff]  ;;  %v437_v31 = vld [vmem:[%s921_s4 + $0x8] sm:$0xff]  ;;  %v455_v34 = vld [vmem:[%s921_s4 + $0x98] sm:$0xff] }
  0x1d   :  { %552 = vmatmul.mubr.msk.f32.vlgmr.msra.gmra.mrb[0].mxu1 %vm98_vm0, %v40_v15  ;;  %v616_v32 = vpack.c.bf16 %v437_v31, %v436_v30  ;;  %v618_v35 = vpack.c.bf16 %v455_v34, %v454_v33  ;;  %v438_v36 = vld [vmem:[%s921_s4 + $0x10] sm:$0xff]  ;;  %v439_v37 = vld [vmem:[%s921_s4 + $0x18] sm:$0xff]  ;;  %v456_v39 = vld [vmem:[%s921_s4 + $0xa0] sm:$0xff]  ;;  %v60_v13 = vsub.s32 0, %v59_v12  ;;  %v72_v19 = vsub.s32 3, %v59_v12 }
  0x1e   :  { %605 = vmatpush1.bf16.msra.mxu1 %v604_v16  ;;  %237 = vmatprep.mubr.f32.mxu1 %v709_v1  ;;  %v620_v38 = vpack.c.bf16 %v439_v37, %v438_v36  ;;  %v457_v40 = vld [vmem:[%s921_s4 + $0xa8] sm:$0xff]  ;;  %v440_v42 = vld [vmem:[%s921_s4 + $0x20] sm:$0xff]  ;;  %v458_v45 = vld [vmem:[%s921_s4 + $0xb0] sm:$0xff]  ;;  %v76_v27 = vsub.s32 4, %v59_v12  ;;  %v80_v30 = vsub.s32 5, %v59_v12  ;;  %v84_v33 = vsub.s32 6, %v59_v12 }
  0x1f   :  { %607 = vmatprep.subr.bf16.mxu1 %v606_v17  ;;  %615 = vmatprep.subr.bf16.mxu0 %v614_v29  ;;  %v622_v41 = vpack.c.bf16 %v457_v40, %v456_v39  ;;  %v441_v43 = vld [vmem:[%s921_s4 + $0x28] sm:$0xff]  ;;  %v459_v46 = vld [vmem:[%s921_s4 + $0xb8] sm:$0xff]  ;;  %v442_v48 = vld [vmem:[%s921_s4 + $0x30] sm:$0xff]  ;;  %v68_v17 = vsub.s32 2, %v59_v12 }
  0x20   :  { %617 = vmatpush3.bf16.msra.mxu0 %v616_v32  ;;  %v624_v44 = vpack.c.bf16 %v441_v43, %v440_v42  ;;  %v626_v47 = vpack.c.bf16 %v459_v46, %v458_v45  ;;  %v443_v49 = vld [vmem:[%s921_s4 + $0x38] sm:$0xff]  ;;  %v460_v51 = vld [vmem:[%s921_s4 + $0xc0] sm:$0xff]  ;;  %v461_v52 = vld [vmem:[%s921_s4 + $0xc8] sm:$0xff] }
  0x21   :  { %553 = vmatmul.mubr.msk.f32.vlgmr.msra.gmra.mrb[2].mxu1 %vm98_vm0, %v40_v15  ;;  %619 = vmatprep.subr.bf16.mxu0 %v618_v35  ;;  %v628_v50 = vpack.c.bf16 %v443_v49, %v442_v48  ;;  %v630_v53 = vpack.c.bf16 %v461_v52, %v460_v51  ;;  %v444_v54 = vld [vmem:[%s921_s4 + $0x40] sm:$0xff]  ;;  %v445_v55 = vld [vmem:[%s921_s4 + $0x48] sm:$0xff]  ;;  %v462_v57 = vld [vmem:[%s921_s4 + $0xd0] sm:$0xff]  ;;  %v88_v35 = vsub.s32 7, %v59_v12 }
  0x22   :  { %609 = vmatpush1.bf16.msra.mxu1 %v608_v22  ;;  %308 = vmatprep.mubr.f32.mxu1 %v709_v1  ;;  %v632_v56 = vpack.c.bf16 %v445_v55, %v444_v54  ;;  %v463_v58 = vld [vmem:[%s921_s4 + $0xd8] sm:$0xff]  ;;  %v446_v59 = vld [vmem:[%s921_s4 + $0x50] sm:$0xff]  ;;  %v464_v62 = vld [vmem:[%s921_s4 + $0xe0] sm:$0xff] }
  0x23   :  { %611 = vmatprep.subr.bf16.mxu1 %v610_v23  ;;  %v634_v60 = vpack.c.bf16 %v463_v58, %v462_v57  ;;  %v447_v61 = vld [vmem:[%s921_s4 + $0x58] sm:$0xff]  ;;  %v465_v63 = vld [vmem:[%s921_s4 + $0xe8] sm:$0xff]  ;;  %v448_v2 = vld [vmem:[%s921_s4 + $0x60] sm:$0xff] }
  0x24   :  { %621 = vmatpush3.bf16.msra.mxu0 %v620_v38  ;;  %v636_v0 = vpack.c.bf16 %v447_v61, %v446_v59  ;;  %v449_v3 = vld [vmem:[%s921_s4 + $0x68] sm:$0xff]  ;;  %v466_v4 = vld [vmem:[%s921_s4 + $0xf0] sm:$0xff]  ;;  %v467_v5 = vld [vmem:[%s921_s4 + $0xf8] sm:$0xff] }
  0x25   :  { %554 = vmatmul.mubr.msk.f32.vlgmr.msra.gmra.mrb[4].mxu1 %vm98_vm0, %v40_v15  ;;  %623 = vmatprep.subr.bf16.mxu0 %v622_v41  ;;  %v640_v6 = vpack.c.bf16 %v449_v3, %v448_v2  ;;  %v642_v7 = vpack.c.bf16 %v467_v5, %v466_v4  ;;  %v450_v8 = vld [vmem:[%s921_s4 + $0x70] sm:$0xff]  ;;  %v451_v9 = vld [vmem:[%s921_s4 + $0x78] sm:$0xff]  ;;  %v39_v14 = vld [vmem:[%s920_s3] sm:$0xff] }
  0x26   :  { %613 = vmatpush1.bf16.msra.mxu1 %v612_v26  ;;  %379 = vmatprep.mubr.f32.mxu1 %v709_v1  ;;  %v638_v1 = vpack.c.bf16 %v465_v63, %v464_v62  ;;  %v644_v10 = vpack.c.bf16 %v451_v9, %v450_v8  ;;  %v61_v16 = vrot.slane %v39_v14, %v60_v13 }
  0x27   :  { %v69_v23 = vrot.slane %v39_v14, %v68_v17  ;;  %v73_v25 = vrot.slane %v39_v14, %v72_v19  ;;  %v77_v37 = vrot.slane %v39_v14, %v76_v27  ;;  %v81_v40 = vrot.slane %v39_v14, %v80_v30 }
  0x28   :  { %625 = vmatpush3.bf16.msra.mxu0 %v624_v44  ;;  %v85_v42 = vrot.slane %v39_v14, %v84_v33  ;;  %v89_v43 = vrot.slane %v39_v14, %v88_v35 }
  0x29   :  { %555 = vmatmul.mubr.msk.f32.vlgmr.msra.gmra.mrb[6].mxu1 %vm98_vm0, %v40_v15  ;;  %627 = vmatprep.subr.bf16.mxu0 %v626_v47  ;;  %v64_v15 = vsub.s32 1, %v59_v12 }
  0x2b   :  { %v65_v18 = vrot.slane %v39_v14, %v64_v15 }
  0x2c   :  { %629 = vmatpush3.bf16.msra.mxu0 %v628_v50 }
  0x2d   :  { %631 = vmatprep.subr.bf16.mxu0 %v630_v53 }
  0x30   :  { %633 = vmatpush3.bf16.msra.mxu0 %v632_v56 }
  0x31   :  { %635 = vmatprep.subr.bf16.mxu0 %v634_v60 }
  0x34   :  { %637 = vmatpush3.bf16.msra.mxu0 %v636_v0 }
  0x35   :  { %639 = vmatprep.subr.bf16.mxu0 %v638_v1 }
  0x38   :  { %641 = vmatpush3.bf16.msra.mxu0 %v640_v6 }
  0x39   :  { %643 = vmatprep.subr.bf16.mxu0 %v642_v7 }
  0x3c   :  { %645 = vmatpush3.bf16.msra.mxu0 %v644_v10 }
  0xf0   :  { %v168_v20 = vpop.f32.mrb[0].mxu1 }
  0xf1   :  { %v169_v21 = vadd.f32 %v168_v20, %v61_v16  ;;  %v170_v22 = vpop.f32.mrb[1].mxu1 }
  0xf2   :  { %v171_v24 = vadd.f32 %v170_v22, %v65_v18 }
  0xf3   :  { %v556_v26 = vmul.f32 -1.442695, %v169_v21  ;;  %v562_v21 = vld [vmem:[#allocation2] ss:$0 sm:$0xff] }
  0xf4   :  { %v557_v28 = vmul.f32 -1.442695, %v171_v24  ;;  %v239_v29 = vpop.f32.mrb[2].mxu1 }
  0xf5   :  { %650 = vpow2.f32 %v556_v26  ;;  %v240_v31 = vadd.f32 %v239_v29, %v69_v23  ;;  %v241_v32 = vpop.f32.mrb[3].mxu1 }
  0xf6   :  { %652 = vpow2.f32 %v557_v28  ;;  %v242_v34 = vadd.f32 %v241_v32, %v73_v25 }
  0xf7   :  { %v558_v36 = vmul.f32 -1.442695, %v240_v31 }
  0xf8   :  { %v559_v38 = vmul.f32 -1.442695, %v242_v34  ;;  %v310_v39 = vpop.f32.mrb[4].mxu1 }
  0xf9   :  { %654 = vpow2.f32 %v558_v36  ;;  %v312_v41 = vpop.f32.mrb[5].mxu1  ;;  %v311_v44 = vadd.f32 %v310_v39, %v77_v37 }
  0xfa   :  { %656 = vpow2.f32 %v559_v38  ;;  %v313_v45 = vadd.f32 %v312_v41, %v81_v40 }
  0xfb   :  { %658 = vtanh.f32 %v311_v44 }
  0xfc   :  { %v381_v46 = vpop.f32.mrb[6].mxu1  ;;  %660 = vtanh.f32 %v313_v45 }
  0xfd   :  { %v382_v47 = vadd.f32 %v381_v46, %v85_v42  ;;  %v383_v48 = vpop.f32.mrb[7].mxu1 }
  0xfe   :  { %v384_v49 = vadd.f32 %v383_v48, %v89_v43 }
  0xff   :  { %v651_v50 = vpop.eup %650  ;;  %v560_v51 = vmul.f32 -1.442695, %v382_v47 }
 0x100   :  { %v653_v52 = vpop.eup %652  ;;  %v392_v53 = vadd.f32 1.0, %v651_v50  ;;  %v561_v54 = vmul.f32 -1.442695, %v384_v49 }
 0x101   :  { %v393_v55 = vadd.f32 1.0, %v653_v52  ;;  %662 = vpow2.f32 %v560_v51 }
 0x102   :  { %664 = vrcp.f32 %v392_v53 }
 0x103   :  { %v655_v56 = vpop.eup %654  ;;  %666 = vrcp.f32 %v393_v55 }
 0x104   :  { %v657_v57 = vpop.eup %656  ;;  %v404_v58 = vadd.f32 1.0, %v655_v56  ;;  %668 = vpow2.f32 %v561_v54 }
 0x105   :  { %v405_v59 = vadd.f32 1.0, %v657_v57  ;;  %v659_v60 = vpop.eup %658 }
 0x106   :  { %670 = vrcp.f32 %v404_v58  ;;  %v661_v61 = vpop.eup %660 }
 0x107   :  { %672 = vrcp.f32 %v405_v59 }
 0x10b   :  { %v663_v62 = vpop.eup %662 }
 0x10c   :  { %v665_v63 = vpop.eup %664  ;;  %v418_v4 = vadd.f32 1.0, %v663_v62 }
 0x10d   :  { %v667_v0 = vpop.eup %666  ;;  %v426_v1 = vmul.f32 %v665_v63, %v659_v60 }
 0x10e   :  { %v669_v2 = vpop.eup %668  ;;  %v427_v3 = vmul.f32 %v667_v0, %v661_v61  ;;  %674 = vrcp.f32 %v418_v4 }
 0x10f   :  { %v419_v6 = vadd.f32 1.0, %v669_v2 }
 0x110   :  { %v671_v5 = vpop.eup %670 }
 0x111   :  { %v673_v7 = vpop.eup %672  ;;  %v424_v8 = vmul.f32 0.0, %v671_v5  ;;  %676 = vrcp.f32 %v419_v6 }
 0x112   :  { %v425_v9 = vmul.f32 0.0, %v673_v7 }
 0x113   :  { %v428_v10 = vadd.f32 %v426_v1, %v424_v8 }
 0x114   :  { %v429_v11 = vadd.f32 %v427_v3, %v425_v9 }
 0x115   :  { %678 = vtanh.f32 %v428_v10 }
 0x116   :  { %680 = vtanh.f32 %v429_v11 }
 0x118   :  { %v675_v12 = vpop.eup %674 }
 0x11b   :  { %v677_v13 = vpop.eup %676 }
 0x11f   :  { %v679_v14 = vpop.eup %678 }
 0x120   :  { %v681_v15 = vpop.eup %680  ;;  %v432_v16 = vmul.f32 %v679_v14, %v675_v12 }
 0x121   :  { %v433_v17 = vmul.f32 %v681_v15, %v677_v13 }
 0x122   :  { %v434_v19 = vmax.f32 %v432_v16, 0.0 }
 0x123   :  { %v435_v18 = vmax.f32 %v433_v17, 0.0 }
 0x125   :  { %539 = vmatprep.mubr.f32.mxu0 %v435_v18 }
 0x126   :  { %540 = vmatmul.mubr.f32.vlgmr.msra.gmra.mrb[0].mxu0 %v434_v19 }
 0x1f9   :  { %v595_v20 = vpop.f32.mrb[0].mxu0 }
 0x1fa   :  { %v596_v22 = vpop.f32.mrb[1].mxu0 }
 0x1fb   :  { %v597_v23 = vadd.f32 %v596_v22, %v595_v20 }
 0x1fd   :  { %v542_v24 = vadd.f32 %v597_v23, %v562_v21 }
 0x1ff   :  { %546 = vst.msk [vmem:[%s923_s6] sm:$0x3] %vm545_vm1, %v542_v24 }
 0x200   :  { %551 = vsyncpa [#allocation4], 1 }

</bundles_post_ra>
